<compile_context>
chip_gen: v7x
topology: tpu7x:2x2x1
jax: 0.10.0
libtpu: 0.0.40
codegen_flags: <defaults>
</compile_context>

<pallas_src>
import functools

import jax
import jax.numpy as jnp
from jax.experimental import pallas as pl
from jax.experimental.pallas import tpu as pltpu


def _round_up(x, m):
    return ((x + m - 1) // m) * m


def _pick_tile(dim_pad, max_tile, min_steps=1):
    # dim_pad is a multiple of 128; pick the largest candidate tile that divides
    # it while leaving at least `min_steps` grid steps (the v7x megacore wants
    # >= 2 steps along the parallel axis so both TensorCores get work).
    for t in (1024, 512, 256, 128):
        if t <= max_tile and dim_pad % t == 0 and dim_pad // t >= min_steps:
            return t
    return 128


def _maybe_pad2d(a, rows, cols, dtype):
    """Cast and zero-pad only when the shape is actually ragged."""
    a = a.astype(dtype)
    r, c = a.shape
    if (r, c) == (rows, cols):
        return a
    return jnp.pad(a, ((0, rows - r), (0, cols - c)))


def _lv_kernel(x_ref, wmu_ref, std_ref, eps_ref, b_ref, out_ref, *,
               tk, apply_relu):
    """One (n, k) grid step of: out = x @ (w_mu + eps * std) + b [+ ReLU].

    x_ref:            (B_pad, K_pad) bf16, resident (constant index_map).
    wmu/std/eps_ref:  (tk, tn) bf16 weight-tile streams.
    b_ref:            (1, tn) f32.
    out_ref:          (B_pad, tn) f32 — resident across the K axis, doubles as
                      the accumulator (no scratch needed).
    """
    k = pl.program_id(1)
    nk = pl.num_programs(1)

    @pl.when(k == 0)
    def _():
        out_ref[...] = jnp.zeros_like(out_ref)

    # Reconstitute this weight tile: W = mu + eps * std.  All-bf16 VPU path;
    # softplus was hoisted to the prep pass so no EUP work remains here.
    w = wmu_ref[...] + eps_ref[...] * std_ref[...]

    # x stays resident in VMEM; slice the K chunk for this step (128-aligned).
    x_k = x_ref[:, pl.ds(pl.multiple_of(k * tk, tk), tk)]

    # bf16 MXU operands, f32 accumulation directly into the output tile.
    out_ref[...] += jnp.dot(x_k, w, preferred_element_type=jnp.float32)

    @pl.when(k == nk - 1)
    def _():
        res = out_ref[...] + b_ref[...]
        if apply_relu:
            res = jnp.maximum(res, 0.0)
        out_ref[...] = res


def linear_variational_forward(x, w_mu, w_rho, b_mu, *, key,
                               apply_relu=False, max_tile=512):
    """x: [B, D_in]; w_mu/w_rho: [D_in, D_out]; b_mu: [D_out] -> [B, D_out] f32."""
    B, D_in = x.shape
    D_in_w, D_out = w_mu.shape
    assert D_in == D_in_w

    # ---- prep pass (pure JAX, fused by XLA): softplus + eps draw + bf16 cast.
    std = jax.nn.softplus(w_rho.astype(jnp.float32))
    eps = jax.random.normal(key, w_mu.shape, dtype=jnp.float32)

    bf16 = jnp.bfloat16
    B_pad = _round_up(max(B, 1), 16)       # 16 sublanes for bf16 x
    K_pad = _round_up(D_in, 128)
    N_pad = _round_up(D_out, 128)
    tk = _pick_tile(K_pad, max_tile)
    tn = _pick_tile(N_pad, max_tile, min_steps=2)

    x_p = _maybe_pad2d(x, B_pad, K_pad, bf16)
    wmu_p = _maybe_pad2d(w_mu, K_pad, N_pad, bf16)
    std_p = _maybe_pad2d(std, K_pad, N_pad, bf16)
    eps_p = _maybe_pad2d(eps, K_pad, N_pad, bf16)
    b_p = _maybe_pad2d(b_mu.astype(jnp.float32).reshape(1, -1), 1, N_pad,
                       jnp.float32)

    grid = (N_pad // tn, K_pad // tk)      # reduction axis (K) last

    in_specs = [
        pl.BlockSpec((B_pad, K_pad), lambda n, k: (0, 0)),   # x resident
        pl.BlockSpec((tk, tn), lambda n, k: (k, n)),         # w_mu
        pl.BlockSpec((tk, tn), lambda n, k: (k, n)),         # std
        pl.BlockSpec((tk, tn), lambda n, k: (k, n)),         # eps
        pl.BlockSpec((1, tn), lambda n, k: (0, n)),          # bias
    ]
    out_spec = pl.BlockSpec((B_pad, tn), lambda n, k: (0, n))  # resident over K

    # VMEM budget: resident x + 3 double-buffered bf16 weight streams + bias +
    # resident f32 output tile, 1.5x headroom, clamped under v7x's 64 MiB.
    vmem_bytes = (2 * B_pad * K_pad * 2          # x (counted x2 conservatively)
                  + 3 * 2 * tk * tn * 2          # w_mu/std/eps, double-buffered
                  + 2 * tn * 4                   # bias
                  + 2 * B_pad * tn * 4)          # output / accumulator
    vmem_limit = int(min(max(int(vmem_bytes * 1.5) + (2 << 20), 16 << 20),
                         48 << 20))

    cost = pl.CostEstimate(
        flops=2 * B_pad * K_pad * N_pad + 2 * K_pad * N_pad,
        transcendentals=0,
        bytes_accessed=(3 * K_pad * N_pad * 2 + B_pad * K_pad * 2
                        + B_pad * N_pad * 4 + N_pad * 4),
    )

    kernel = functools.partial(_lv_kernel, tk=tk, apply_relu=apply_relu)

    y_p = pl.pallas_call(
        kernel,
        out_shape=jax.ShapeDtypeStruct((B_pad, N_pad), jnp.float32),
        grid_spec=pltpu.PrefetchScalarGridSpec(
            num_scalar_prefetch=0,
            grid=grid,
            in_specs=in_specs,
            out_specs=out_spec,
        ),
        compiler_params=pltpu.CompilerParams(
            dimension_semantics=("parallel", "arbitrary"),
            vmem_limit_bytes=vmem_limit,
        ),
        cost_estimate=cost,
    )(x_p, wmu_p, std_p, eps_p, b_p)

    return y_p[:B, :D_out]


def variational_mlp_forward(x, params, *, seed, max_tile=512):
    """params: [(w_mu, w_rho, b_mu), ...]; ReLU between layers (not after last)."""
    # TODO(synk): for many Monte-Carlo samples, stack them on the batch axis so
    # the per-sample weight stream is amortized over a larger M.
    base_key = jax.random.PRNGKey(seed)
    h = x
    n_layers = len(params)
    for i, (w_mu, w_rho, b_mu) in enumerate(params):
        h = linear_variational_forward(
            h, w_mu, w_rho, b_mu,
            key=jax.random.fold_in(base_key, i),
            apply_relu=(i < n_layers - 1),
            max_tile=max_tile)
    return h


if __name__ == "__main__":
    # Small, deterministic example consistent with the module's forward.
    B, D_in, D_hidden, D_out = 16, 32, 256, 8
    key = jax.random.PRNGKey(0)
    ks = jax.random.split(key, 7)

    x = jax.random.normal(ks[0], (B, D_in), dtype=jnp.float32)
    # The module initializes params to zeros; use small random values so the
    # softplus, the eps FMA and the bias add are actually exercised.
    w1_mu = 0.1 * jax.random.normal(ks[1], (D_in, D_hidden), dtype=jnp.float32)
    w1_rho = -3.0 + 0.1 * jax.random.normal(ks[2], (D_in, D_hidden), dtype=jnp.float32)
    b1_mu = 0.1 * jax.random.normal(ks[3], (D_hidden,), dtype=jnp.float32)
    w2_mu = 0.1 * jax.random.normal(ks[4], (D_hidden, D_out), dtype=jnp.float32)
    w2_rho = -3.0 + 0.1 * jax.random.normal(ks[5], (D_hidden, D_out), dtype=jnp.float32)
    b2_mu = 0.1 * jax.random.normal(ks[6], (D_out,), dtype=jnp.float32)
    params = [(w1_mu, w1_rho, b1_mu), (w2_mu, w2_rho, b2_mu)]

    seed = 42
    # max_tile=128 forces multi-step grids even at these toy sizes so both the
    # K-accumulation path and the parallel-N path are exercised.
    y = variational_mlp_forward(x, params, seed=seed, max_tile=128)
    y = jax.block_until_ready(y)

    # Pure-JAX reference using the *same* eps draws (identical key derivation),
    # mirroring the kernel's bf16 operands with f32 accumulation.
    base_key = jax.random.PRNGKey(seed)

    def ref_layer(xx, w_mu, w_rho, b, k, relu):
        std = jax.nn.softplus(w_rho)
        eps = jax.random.normal(k, w_mu.shape, dtype=jnp.float32)
        w = (w_mu.astype(jnp.bfloat16)
             + eps.astype(jnp.bfloat16) * std.astype(jnp.bfloat16))
        acc = jnp.dot(xx.astype(jnp.bfloat16), w,
                      preferred_element_type=jnp.float32) + b
        return jnp.maximum(acc, 0.0) if relu else acc

    h_ref = ref_layer(x, w1_mu, w1_rho, b1_mu, jax.random.fold_in(base_key, 0), True)
    y_ref = ref_layer(h_ref, w2_mu, w2_rho, b2_mu, jax.random.fold_in(base_key, 1), False)

    assert y.shape == (B, D_out)
    assert bool(jnp.all(jnp.isfinite(y)))
    max_err = float(jnp.max(jnp.abs(y - y_ref)))
    assert jnp.allclose(y, y_ref, atol=3e-2, rtol=3e-2), max_err

    print("KERNEL_OK")
</pallas_src>

<mosaic_0001>
module attributes {stable_mosaic.version = 11 : i64} {
  func.func @_lv_kernel(%arg0: i32, %arg1: i32, %arg2: memref<16x128xbf16, #tpu.memory_space<vmem>>, %arg3: memref<128x128xbf16, #tpu.memory_space<vmem>>, %arg4: memref<128x128xbf16, #tpu.memory_space<vmem>>, %arg5: memref<128x128xbf16, #tpu.memory_space<vmem>>, %arg6: memref<1x128xf32, #tpu.memory_space<vmem>>, %arg7: memref<16x128xf32, #tpu.memory_space<vmem>>) attributes {dimension_semantics = [#tpu.dimension_semantics<parallel>, #tpu.dimension_semantics<arbitrary>], iteration_bounds = array<i64: 2, 1>, scalar_prefetch = 0 : i64, scratch_operands = 0 : i64, tpu.core_type = #tpu.core_type<tc>, window_params = [{pipeline_mode = #tpu.pipeline_mode<synchronous>, transform_indices = @transform_0, window_bounds = array<i64: 16, 128>}, {transform_indices = @transform_1, window_bounds = array<i64: 128, 128>}, {transform_indices = @transform_2, window_bounds = array<i64: 128, 128>}, {transform_indices = @transform_3, window_bounds = array<i64: 128, 128>}, {transform_indices = @transform_4, window_bounds = array<i64: 1, 128>}, {transform_indices = @transform_5, window_bounds = array<i64: 16, 128>}]} {
    %c0_i32 = arith.constant 0 : i32
    %0 = arith.cmpi eq, %arg1, %c0_i32 : i32
    %1 = arith.extui %0 : i1 to i32
    %c0_i32_0 = arith.constant 0 : i32
    %2 = arith.cmpi ne, %1, %c0_i32_0 : i32
    scf.if %2 {
      %cst_13 = arith.constant 0.000000e+00 : f32
      %19 = vector.broadcast %cst_13 : f32 to vector<16x128xf32>
      %c0_14 = arith.constant 0 : index
      %c0_15 = arith.constant 0 : index
      %20 = vector.load %arg7[%c0_14, %c0_15] : memref<16x128xf32, #tpu.memory_space<vmem>>, vector<16x128xf32>
      tpu.vector_store %arg7[%c0_14, %c0_15], %19 {strides = array<i32>} : memref<16x128xf32, #tpu.memory_space<vmem>>, vector<16x128xf32>,
    } else {
    }
    %c0 = arith.constant 0 : index
    %c0_1 = arith.constant 0 : index
    %3 = vector.load %arg3[%c0, %c0_1] : memref<128x128xbf16, #tpu.memory_space<vmem>>, vector<128x128xbf16>
    %c0_2 = arith.constant 0 : index
    %c0_3 = arith.constant 0 : index
    %4 = vector.load %arg5[%c0_2, %c0_3] : memref<128x128xbf16, #tpu.memory_space<vmem>>, vector<128x128xbf16>
    %c0_4 = arith.constant 0 : index
    %c0_5 = arith.constant 0 : index
    %5 = vector.load %arg4[%c0_4, %c0_5] : memref<128x128xbf16, #tpu.memory_space<vmem>>, vector<128x128xbf16>
    %6 = arith.mulf %4, %5 : vector<128x128xbf16>
    %7 = arith.addf %3, %6 : vector<128x128xbf16>
    %c128_i32 = arith.constant 128 : i32
    %8 = arith.muli %arg1, %c128_i32 : i32
    %9 = tpu.assume_multiple %8, 128 : i32
    %c0_6 = arith.constant 0 : index
    %10 = arith.index_cast %9 : i32 to index
    %11 = vector.load %arg2[%c0_6, %10] : memref<16x128xbf16, #tpu.memory_space<vmem>>, vector<16x128xbf16>
    %c0_7 = arith.constant 0 : index
    %c0_8 = arith.constant 0 : index
    %12 = vector.load %arg7[%c0_7, %c0_8] : memref<16x128xf32, #tpu.memory_space<vmem>>, vector<16x128xf32>
    %cst = arith.constant dense<0.000000e+00> : vector<16x128xf32>
    %13 = tpu.matmul %11, %7, %cst {dimension_numbers = #tpu.dot_dimension_numbers<[1], [0], [0], [1], [0, 0, 1, 1], [], []>} : vector<16x128xbf16>, vector<128x128xbf16>, vector<16x128xf32> -> vector<16x128xf32>
    %14 = arith.addf %12, %13 : vector<16x128xf32>
    %c0_9 = arith.constant 0 : index
    %c0_10 = arith.constant 0 : index
    %15 = vector.load %arg7[%c0_9, %c0_10] : memref<16x128xf32, #tpu.memory_space<vmem>>, vector<16x128xf32>
    tpu.vector_store %arg7[%c0_9, %c0_10], %14 {strides = array<i32>} : memref<16x128xf32, #tpu.memory_space<vmem>>, vector<16x128xf32>,
    %c0_i32_11 = arith.constant 0 : i32
    %16 = arith.cmpi eq, %arg1, %c0_i32_11 : i32
    %17 = arith.extui %16 : i1 to i32
    %c0_i32_12 = arith.constant 0 : i32
    %18 = arith.cmpi ne, %17, %c0_i32_12 : i32
    scf.if %18 {
      %c0_13 = arith.constant 0 : index
      %c0_14 = arith.constant 0 : index
      %19 = vector.load %arg7[%c0_13, %c0_14] : memref<16x128xf32, #tpu.memory_space<vmem>>, vector<16x128xf32>
      %c0_15 = arith.constant 0 : index
      %c0_16 = arith.constant 0 : index
      %20 = vector.load %arg6[%c0_15, %c0_16] : memref<1x128xf32, #tpu.memory_space<vmem>>, vector<1x128xf32>
      %21 = vector.broadcast %20 : vector<1x128xf32> to vector<16x128xf32>
      %22 = arith.addf %19, %21 : vector<16x128xf32>
      %cst_17 = arith.constant 0.000000e+00 : f32
      %23 = vector.broadcast %cst_17 : f32 to vector<16x128xf32>
      %24 = arith.maximumf %22, %23 : vector<16x128xf32>
      %c0_18 = arith.constant 0 : index
      %c0_19 = arith.constant 0 : index
      %25 = vector.load %arg7[%c0_18, %c0_19] : memref<16x128xf32, #tpu.memory_space<vmem>>, vector<16x128xf32>
      tpu.vector_store %arg7[%c0_18, %c0_19], %24 {strides = array<i32>} : memref<16x128xf32, #tpu.memory_space<vmem>>, vector<16x128xf32>,
    } else {
    }
    return
  }
  func.func @transform_0(%arg0: i32, %arg1: i32) -> (i32, i32) {
    %c0_i32 = arith.constant 0 : i32
    %c0_i32_0 = arith.constant 0 : i32
    %c0_i32_1 = arith.constant 0 : i32
    return %c0_i32, %c0_i32_0 : i32, i32
  }
  func.func @transform_1(%arg0: i32, %arg1: i32) -> (i32, i32) {
    %c0_i32 = arith.constant 0 : i32
    return %arg1, %arg0 : i32, i32
  }
  func.func @transform_2(%arg0: i32, %arg1: i32) -> (i32, i32) {
    %c0_i32 = arith.constant 0 : i32
    return %arg1, %arg0 : i32, i32
  }
  func.func @transform_3(%arg0: i32, %arg1: i32) -> (i32, i32) {
    %c0_i32 = arith.constant 0 : i32
    return %arg1, %arg0 : i32, i32
  }
  func.func @transform_4(%arg0: i32, %arg1: i32) -> (i32, i32) {
    %c0_i32 = arith.constant 0 : i32
    %c0_i32_0 = arith.constant 0 : i32
    return %c0_i32, %arg0 : i32, i32
  }
  func.func @transform_5(%arg0: i32, %arg1: i32) -> (i32, i32) {
    %c0_i32 = arith.constant 0 : i32
    %c0_i32_0 = arith.constant 0 : i32
    return %c0_i32, %arg0 : i32, i32
  }
}

</mosaic_0001>

<bundles_post_ra>
// kernel: tpu_custom_call.1
= control target key start
LH: loop header
LB: loop body
LE: loop exit
PB: predicated region body
PF: predicated region fallthrough
CT: control target
= control target key end

     0   :  { %s1549_s0 = inlined_call_operand.hbm [shape: bf16[16,128], index: 0, kind: input, shape index: {}]   ;;  %s1550_s1 = inlined_call_operand.hbm [shape: bf16[128,256], index: 1, kind: input, shape index: {}]   ;;  %s1551_s2 = inlined_call_operand.hbm [shape: bf16[128,256], index: 2, kind: input, shape index: {}]   ;;  %s1552_s3 = inlined_call_operand.hbm [shape: bf16[128,256], index: 3, kind: input, shape index: {}]   ;;  %s1553_s4 = inlined_call_operand.vmem [shape: f32[1,256], index: 4, kind: input, shape index: {}]   ;;  %s1554_s5 = inlined_call_operand.hbm [shape: f32[16,256], index: 5, kind: output, shape index: {}]  }
   0x1   :  { %1580 = sst [smem:[#allocation22_spill]] %s1550_s1 }
   0x2   :  { %1581 = sst [smem:[#allocation23_spill]] %s1551_s2 }
   0x3   :  { %1582 = sst [smem:[#allocation24_spill]] %s1554_s5 }
   0x4   :  { %10 = vsyncpa [#allocation3], 0 }
   0x5   :  { %11 = vsyncpa [#allocation6], 0 }
   0x6   :  { %13 = vsyncpa [#allocation6 + $0x1], 0 }
   0x7   :  { %14 = vsyncpa [#allocation9], 0 }
   0x8   :  { %16 = vsyncpa [#allocation9 + $0x1], 0 }
   0x9   :  { %17 = vsyncpa [#allocation4], 0 }
   0xa   :  { %19 = vsyncpa [#allocation4 + $0x1], 0  ;;  %s1160_s18 = smov 0   ;;  %s1162_s19 = smov 0  }
   0xb   :  { %s1164_s20 = smov 0   ;;  %s1166_s21 = smov 0  }
   0xc   :  { %s1168_s22 = smov 0   ;;  %s1170_s23 = smov 0  }
   0xd LB: > { %1583 = sst [smem:[#allocation15_spill]] %s1095_s18  ;;  %s37_s24 = sadd.s32 1, %s1111_s22  ;;  %s1115_s23 = sphi %s1170_s23, %s25_s23   ;;  %s1111_s22 = sphi %s1168_s22, %s1622_s22   ;;  %s1107_s21 = sphi %s1166_s21, %s1621_s21   ;;  %s1103_s20 = sphi %s1164_s20, %s1625_s20   ;;  %s1099_s19 = sphi %s1162_s19, %s1624_s19   ;;  %s1095_s18 = sphi %s1160_s18, %s1623_s18  }
   0xe   : > { %1584 = sst [smem:[#allocation16_spill]] %s1111_s22  ;;  %s67_s25 = sadd.s32 1, %s1103_s20 }
   0xf   : > { %1585 = sst [smem:[#allocation17_spill]] %s1115_s23  ;;  %p39_p0 = scmp.ge.s32.totalorder %s37_s24, 2 }
  0x10   : > { %p1555_p1 = scmp.ne.s32.totalorder %s1103_s20, %s1099_s19  ;;  %p75_p2 = scmp.eq.s32.totalorder %s1115_s23, 0 }
  0x11   : > { %s1627_s24 = smov (%p39_p0, %s37_s24), 0  ;;  %p846_p6 = scmp.lt.s32.totalorder %s1115_s23, 2 }
  0x12   : > { %1586 = sst [smem:[#allocation18_spill]] %s1627_s24  ;;  %p1200_p3 = por %p75_p2, %p1555_p1 }
  0x13   : > { %s63_s27 = ssub.s32 %s1111_s22, %s1627_s24  ;;  %s225_s28 = sand.u32 1, %s1115_s23  }
  0x14   : > { %p65_p5 = scmp.eq.s32.totalorder %s63_s27, 0  ;;  %s1556_s29 = sand.u32 1, %s1103_s20  }
  0x15   : > { %s1215_s6 = sshll.u32 %s1556_s29, 6  ;;  %s1218_s7 = sshll.u32 %s1111_s22, 6 }
  0x16   : > { %s1211_s30 = scalar_select %p65_p5, %s1103_s20, %s67_s25  }
  0x17   : > { %s1589_s1 = sld [smem:[#allocation22_spill]]  ;;  %s229_s11 = scalar_lea.vmem [#allocation5], %s1215_s6 }
  0x18   : > { %1588 = sst [smem:[#allocation19_spill]] %s1211_s30  ;;  %s238_s12 = sshll.u32 %s229_s11, 4  ;;  %s1227_s12 = int_to_ptr.vmem [resolvable:$true] %s238_s12 }
  0x19   : > { %p1231_p7 = pnand %p846_p6, %p1200_p3  ;;  %s1235_s14 = scalar_lea.sflag [#allocation6], %s225_s28 }
  0x1b   : > { %s1590_s13 = scalar_select %p1231_p7, 1, 0 }
  0x1c   : > { %p1241_p9 = pneg %p1231_p7 }
  0x1d   : > { %s1224_s10 = scalar_lea.hbm %s1589_s1, %s1218_s7  ;;  %s912_s26 = scalar_lea.hbm %s1589_s1, 2048 }
  0x1e   : > { %s907_s15 = scalar_lea.hbm %s1224_s10, 1024  ;;  %p913_p12 = scmp.lt.u32.totalorder %s1224_s10, %s1589_s1 }
  0x1f   : > { %p908_p8 = scmp.ne.s32.totalorder %s1224_s10, %s907_s15  ;;  %p914_p13 = scmp.lt.u32.totalorder %s912_s26, %s907_s15 }
  0x20   : > { %s1591_s16 = scalar_select %p1241_p9, 1, 0 }
  0x21   : > { %p910_p10 = pnand %p1241_p9, %p908_p8  ;;  %p915_p0 = por %p914_p13, %p913_p12 }
  0x22   : > { %p916_p2 = scmp.lt.u32.totalorder %s907_s15, %s1224_s10 }
  0x23   : > { %p911_p11 = pneg %p910_p10 }
  0x24   : > { %p917_p3 = por %p916_p2, %p915_p0 }
  0x26   : > { %p918_p5 = pnand %p917_p3, %p911_p11 }
  0x28   : > { %921 = shalt.err (!%p918_p5)
}
  0x29   : > { %s922_s28 = scalar_lea.vmem %s1227_s12, 1024  ;;  %s1117_s9 = smov [#allocation5]  }
  0x2a   : > { %p923_p6 = scmp.ne.s32.totalorder %s1227_s12, %s922_s28  ;;  %s927_s11 = sshll.u32 %s1117_s9, 4  ;;  %s928_s11 = int_to_ptr.vmem [resolvable:$false] %s927_s11 }
  0x2b   : > { %s929_s17 = scalar_lea.vmem %s928_s11, 2048  ;;  %p930_p4 = scmp.lt.s32.totalorder %s1227_s12, %s928_s11 }
  0x2c   : > { %p925_p8 = pnand %p923_p6, %p1241_p9  ;;  %p931_p1 = scmp.lt.s32.totalorder %s929_s17, %s922_s28 }
  0x2e   : > { %p926_p10 = pneg %p925_p8  ;;  %p932_p12 = por %p931_p1, %p930_p4 }
  0x30   : > { %p933_p13 = pnand %p932_p12, %p926_p10 }
  0x32   : > { %936 = shalt.err (!%p933_p13)
}
  0x33   : > { %s1557_s15 = smov 128   ;;  %s1559_s25 = smov 64  }
  0x34   : > { %s1561_s26 = smov 4   ;;  %s1269_s27 = sadd.s32 4294967295, %s1115_s23  }
  0x35   : > { %834 = dma.hbm_to_vmem [thread:$0]  (!%p1231_p7), %s1224_s10, 1024, %s1227_s12, %s1235_s14, %s1557_s15, %s1559_s25, %s1561_s26  }
  0x36   : > { %s756_s8 = sadd.s32 4294967294, %s1115_s23   ;;  %p80_p1 = scmp.ne.s32.totalorder %s1099_s19, %s1095_s18 }
  0x37   : > { %p1566_p4 = scmp.eq.s32.totalorder %s1269_s27, 0  ;;  %p186_p11 = scmp.eq.s32.totalorder %s1269_s27, 1 }
  0x38   : > { %p192_p0 = scmp.eq.s32.totalorder %s756_s8, 1  ;;  %p757_p3 = scmp.ge.s32.totalorder %s1115_s23, 1 }
  0x39   : > { %p1278_p2 = por %p1566_p4, %p80_p1  ;;  %p1593_p5 = scmp.ne.s32.totalorder %s1103_s20, %s1099_s19 }
  0x3a   : > { %p1290_p8 = por %p192_p0, %p80_p1  ;;  %p199_p10 = scmp.lt.s32.totalorder %s1115_s23, 3 }
  0x3b   : > { %s1592_s28 = scalar_select %p1278_p2, 1, 0 }
  0x3c   : > { %p1286_p6 = por %p186_p11, %p1593_p5  ;;  %p1295_p12 = pnand %p757_p3, %p199_p10 }
  0x3d   : > { %s1596_s12 = scalar_select %p1290_p8, 1, 0 }
  0x3e   : > { %s1594_s10 = scalar_select %p1286_p6, 1, 0 }
  0x3f   : > { %1597 = sst [smem:[#allocation21_spill]] %s1596_s12  ;;  %s1121_s11 = smov [#allocation2]  }
  0x40   : > { %1595 = sst [smem:[#allocation20_spill]] %s1594_s10  ;;  %s211_s17 = sshll.u32 %s1121_s11, 4  ;;  %s1299_s17 = int_to_ptr.vmem [resolvable:$true] %s211_s17 }
  0x41   : > { %s1598_s9 = scalar_select %p1295_p12, 1, 0 }
  0x42   : > { %s1599_s2 = sld [smem:[#allocation23_spill]]  ;;  %p827_p13 = pneg %p1295_p12 }
  0x43   : > { %s252_s25 = scalar_lea.vmem [#allocation7], %s1215_s6 }
  0x44   : > { %s261_s26 = sshll.u32 %s252_s25, 4  ;;  %p1314_p1 = pnand %p827_p13, %p1566_p4  ;;  %s1310_s26 = int_to_ptr.vmem [resolvable:$true] %s261_s26 }
  0x46   : > { %s1600_s11 = scalar_select %p1314_p1, 1, 0 }
  0x48   : > { %s1305_s15 = scalar_lea.hbm %s1599_s2, %s1218_s7  ;;  %s942_s24 = scalar_lea.hbm %s1599_s2, 2048 }
  0x49   : > { %s937_s1 = scalar_lea.hbm %s1305_s15, 1024  ;;  %p943_p5 = scmp.lt.u32.totalorder %s1305_s15, %s1599_s2 }
  0x4a   : > { %p938_p11 = scmp.ne.s32.totalorder %s1305_s15, %s937_s1  ;;  %p944_p10 = scmp.lt.u32.totalorder %s942_s24, %s937_s1 }
  0x4b   : > { %p946_p6 = scmp.lt.u32.totalorder %s937_s1, %s1305_s15 }
  0x4c   : > { %p940_p0 = pnand %p938_p11, %p1241_p9  ;;  %p945_p8 = por %p944_p10, %p943_p5 }
  0x4e   : > { %p941_p3 = pneg %p940_p0  ;;  %p947_p13 = por %p946_p6, %p945_p8 }
  0x50   : > { %p948_p4 = pnand %p947_p13, %p941_p3 }
  0x52   : > { %951 = shalt.err (!%p948_p4)
}
  0x53   : > { %s952_s25 = scalar_lea.vmem %s1310_s26, 1024  ;;  %s1122_s29 = smov [#allocation7]  }
  0x54   : > { %p953_p11 = scmp.ne.s32.totalorder %s1310_s26, %s952_s25  ;;  %s957_s8 = sshll.u32 %s1122_s29, 4  ;;  %s958_s8 = int_to_ptr.vmem [resolvable:$false] %s957_s8 }
  0x55   : > { %s959_s22 = scalar_lea.vmem %s958_s8, 2048  ;;  %p960_p12 = scmp.lt.s32.totalorder %s1310_s26, %s958_s8 }
  0x56   : > { %p955_p0 = pnand %p953_p11, %p1241_p9  ;;  %p961_p1 = scmp.lt.s32.totalorder %s959_s22, %s952_s25 }
  0x58   : > { %p956_p2 = pneg %p955_p0  ;;  %p962_p5 = por %p961_p1, %p960_p12 }
  0x5a   : > { %p963_p10 = pnand %p962_p5, %p956_p2 }
  0x5c   : > { %966 = shalt.err (!%p963_p10)
}
  0x5d   : > { %s1601_s1 = smov 4   ;;  %s1602_s24 = smov 64  }
  0x5e   : > { %s1603_s30 = smov 128   ;;  %s1347_s23 = scalar_lea.hbm %s1552_s3, %s1218_s7 }
  0x5f   : > { %837 = dma.hbm_to_vmem [thread:$0]  (!%p1231_p7), %s1305_s15, 1024, %s1310_s26, %s1235_s14, %s1603_s30, %s1602_s24, %s1601_s1  }
  0x60   : > { %s967_s22 = scalar_lea.hbm %s1549_s0, 128  ;;  %p1604_p2 = scmp.ne.s32.totalorder %s1600_s11, 0 }
  0x61   : > { %p968_p4 = scmp.ne.s32.totalorder %s1549_s0, %s967_s22  ;;  %p974_p1 = scmp.lt.u32.totalorder %s967_s22, %s1549_s0 }
  0x62   : > { %p969_p6 = pneg %p1604_p2 }
  0x64   : > { %p970_p8 = pnand %p969_p6, %p968_p4 }
  0x66   : > { %p971_p12 = pneg %p970_p8 }
  0x68   : > { %p976_p3 = pnand %p974_p1, %p971_p12 }
  0x6a   : > { %979 = shalt.err (!%p976_p3)
}
  0x6b   : > { %s980_s2 = scalar_lea.vmem %s1299_s17, 128  ;;  %p988_p5 = scmp.lt.s32.totalorder %s1299_s17, %s1299_s17 }
  0x6c   : > { %p981_p13 = scmp.ne.s32.totalorder %s1299_s17, %s980_s2  ;;  %p989_p10 = scmp.lt.s32.totalorder %s980_s2, %s980_s2 }
  0x6e   : > { %p983_p11 = pnand %p981_p13, %p969_p6  ;;  %p990_p7 = por %p989_p10, %p988_p5 }
  0x70   : > { %p984_p0 = pneg %p983_p11 }
  0x72   : > { %p991_p9 = pnand %p990_p7, %p984_p0 }
  0x74   : > { %994 = shalt.err (!%p991_p9)
}
  0x75   : > { %830 = dma.hbm_to_vmem [thread:$0]  (!%p1604_p2), %s1549_s0, 128, %s1299_s17, [#allocation3], %s1602_s24, %s1602_s24, %s1601_s1  }
  0x76   : > { %s275_s7 = scalar_lea.vmem [#allocation8], %s1215_s6  ;;  %s1605_s15 = sand.u32 1, %s1103_s20  }
  0x77   : > { %s284_s14 = sshll.u32 %s275_s7, 4  ;;  %s1378_s26 = scalar_lea.sflag [#allocation9], %s1605_s15  ;;  %s1374_s14 = int_to_ptr.vmem [resolvable:$true] %s284_s14 }
  0x78   : > { %s995_s10 = scalar_lea.hbm %s1347_s23, 1024  ;;  %p1606_p9 = scmp.ne.s32.totalorder %s1591_s16, 0 }
  0x79   : > { %p996_p7 = scmp.ne.s32.totalorder %s1347_s23, %s995_s10  ;;  %s1000_s29 = scalar_lea.hbm %s1552_s3, 2048 }
  0x7a   : > { %p1001_p2 = scmp.lt.u32.totalorder %s1347_s23, %s1552_s3  ;;  %p1002_p8 = scmp.lt.u32.totalorder %s1000_s29, %s995_s10 }
  0x7b   : > { %p998_p4 = pnand %p996_p7, %p1606_p9  ;;  %p1004_p1 = scmp.lt.u32.totalorder %s995_s10, %s1347_s23 }
  0x7c   : > { %p1003_p12 = por %p1002_p8, %p1001_p2 }
  0x7d   : > { %p999_p6 = pneg %p998_p4 }
  0x7e   : > { %p1005_p3 = por %p1004_p1, %p1003_p12 }
  0x80   : > { %p1006_p13 = pnand %p1005_p3, %p999_p6 }
  0x82   : > { %1009 = shalt.err (!%p1006_p13)
}
  0x83   : > { %s1010_s6 = scalar_lea.vmem %s1374_s14, 1024  ;;  %s1123_s17 = smov [#allocation8]  }
  0x84   : > { %p1011_p11 = scmp.ne.s32.totalorder %s1374_s14, %s1010_s6  ;;  %s1015_s22 = sshll.u32 %s1123_s17, 4  ;;  %s1016_s22 = int_to_ptr.vmem [resolvable:$false] %s1015_s22 }
  0x85   : > { %s1017_s2 = scalar_lea.vmem %s1016_s22, 2048  ;;  %p1018_p10 = scmp.lt.s32.totalorder %s1374_s14, %s1016_s22 }
  0x86   : > { %p1013_p0 = pnand %p1011_p11, %p1606_p9  ;;  %p1019_p7 = scmp.lt.s32.totalorder %s1017_s2, %s1010_s6 }
  0x88   : > { %p1014_p5 = pneg %p1013_p0  ;;  %p1020_p4 = por %p1019_p7, %p1018_p10 }
  0x8a   : > { %p1021_p2 = pnand %p1020_p4, %p1014_p5 }
  0x8c   : > { %1024 = shalt.err (!%p1021_p2)
}
  0x8d   : > { %p1607_p6 = scmp.ne.s32.totalorder %s1590_s13, 0  ;;  %p1608_p9 = scmp.ne.s32.totalorder %s1598_s9, 0 }
  0x8e   : > { %p1609_p8 = scmp.eq.s32.totalorder (!%p1608_p9), %s1269_s27, 0 }
  0x8f   : > { %840 = dma.hbm_to_vmem [thread:$0]  (!%p1607_p6), %s1347_s23, 1024, %s1374_s14, %s1378_s26, %s1603_s30, %s1602_s24, %s1601_s1  }
  0x90   : > { %302 = sbr.rel (%p1608_p9) target bundleno = 435 (0x1b3), region = 40 }
  0x97   : > { %1078 = dma.done.wait (%p1609_p8), [#allocation3], 128   ;;  %p1610_p12 = pmov %p1609_p8 }
  0x98   : > { %s308_s13 = sand.u32 1, %s1269_s27   ;;  %s1413_s16 = sand.u32 1, %s1099_s19  }
  0x99   : > { %1080 = vsyncadd (%p1610_p12), [#allocation3], 4294967168  ;;  %s768_s5 = sshll.u32 %s1413_s16, 6  ;;  %s309_s18 = scalar_lea.sflag [#allocation6], %s308_s13 }
  0x9a   : > { %s1416_s7 = scalar_lea.vmem [#allocation5], %s768_s5  ;;  %p1611_p1 = scmp.ne.s32.totalorder %s1592_s28, 0 }
  0x9c   : > { %1082 = dma.done.wait (%p1611_p1), %s309_s18, 2048  }
  0x9d   : > { %1084 = vsyncadd (%p1611_p1), %s309_s18, 4294965248  ;;  %s1422_s23 = scalar_lea.vmem [#allocation7], %s768_s5  ;;  %s327_s9 = scalar_lea.sflag [#allocation9], %s1413_s16 }
  0x9e   : > { %s1425_s1 = scalar_lea.vmem [#allocation8], %s768_s5 }
  0x9f   : > { %1086 = dma.done.wait (%p1611_p1), %s327_s9, 1024  }
  0xa0   : > { %1088 = vsyncadd (%p1611_p1), %s327_s9, 4294966272  ;;  %v1124_v0 = vmov 0.0   ;;  %vm1125_vm0 = vmmov 0   ;;  %v383_v1 = vld [vmem:[%s1416_s7] sm:$0xf]  ;;  %p373_p3 = scmp.lt.s32.totalorder %s1107_s21, 1 }
  0xa1   : > { %795 = vmatprep.subr.bf16.mxu0 %v1124_v0  ;;  %811 = vmatprep.mubr.msk.bf16.mxu0 %vm1125_vm0, %v1124_v0  ;;  %v384_v2 = vld [vmem:[%s1416_s7 + $0x4] sm:$0xf]  ;;  %v399_v3 = vld [vmem:[%s1425_s1] sm:$0xf]  ;;  %v385_v9 = vld [vmem:[%s1416_s7 + $0x8] sm:$0xf] }
  0xa2   : > { %v400_v4 = vld [vmem:[%s1425_s1 + $0x4] sm:$0xf]  ;;  %v415_v5 = vld [vmem:[%s1422_s23] sm:$0xf]  ;;  %v386_v10 = vld [vmem:[%s1416_s7 + $0xc] sm:$0xf] }
  0xa3   : > { %v416_v6 = vld [vmem:[%s1422_s23 + $0x4] sm:$0xf]  ;;  %v431_v7 = vmul.bf16 %v415_v5, %v399_v3  ;;  %v401_v11 = vld [vmem:[%s1425_s1 + $0x8] sm:$0xf]  ;;  %v402_v12 = vld [vmem:[%s1425_s1 + $0xc] sm:$0xf] }
  0xa4   : > { %v432_v8 = vmul.bf16 %v416_v6, %v400_v4  ;;  %v417_v13 = vld [vmem:[%s1422_s23 + $0x8] sm:$0xf]  ;;  %v418_v14 = vld [vmem:[%s1422_s23 + $0xc] sm:$0xf]  ;;  %v387_v19 = vld [vmem:[%s1416_s7 + $0x10] sm:$0xf] }
  0xa5   : > { %v447_v15 = vadd.bf16 %v431_v7, %v383_v1  ;;  %v433_v17 = vmul.bf16 %v417_v13, %v401_v11  ;;  %v434_v18 = vmul.bf16 %v418_v14, %v402_v12  ;;  %v403_v20 = vld [vmem:[%s1425_s1 + $0x10] sm:$0xf]  ;;  %v404_v21 = vld [vmem:[%s1425_s1 + $0x14] sm:$0xf]  ;;  %v405_v29 = vld [vmem:[%s1425_s1 + $0x18] sm:$0xf] }
  0xa6   : > { %v448_v16 = vadd.bf16 %v432_v8, %v384_v2  ;;  %v419_v22 = vld [vmem:[%s1422_s23 + $0x10] sm:$0xf]  ;;  %v420_v23 = vld [vmem:[%s1422_s23 + $0x14] sm:$0xf]  ;;  %v406_v31 = vld [vmem:[%s1425_s1 + $0x1c] sm:$0xf] }
  0xa7   : > { %v449_v25 = vadd.bf16 %v433_v17, %v385_v9  ;;  %v450_v26 = vadd.bf16 %v434_v18, %v386_v10  ;;  %v388_v27 = vld [vmem:[%s1416_s7 + $0x14] sm:$0xf]  ;;  %v435_v28 = vmul.bf16 %v419_v22, %v403_v20  ;;  %v436_v30 = vmul.bf16 %v420_v23, %v404_v21  ;;  %v421_v32 = vld [vmem:[%s1422_s23 + $0x18] sm:$0xf]  ;;  %v422_v33 = vld [vmem:[%s1422_s23 + $0x1c] sm:$0xf] }
  0xa8   : > { %v773_v24 = vcombine.low %v447_v15, %v448_v16  ;;  %v389_v36 = vld [vmem:[%s1416_s7 + $0x18] sm:$0xf]  ;;  %v390_v37 = vld [vmem:[%s1416_s7 + $0x1c] sm:$0xf]  ;;  %v437_v38 = vmul.bf16 %v421_v32, %v405_v29  ;;  %v438_v39 = vmul.bf16 %v422_v33, %v406_v31  ;;  %v407_v40 = vld [vmem:[%s1425_s1 + $0x20] sm:$0xf] }
  0xa9   : > { %v774_v34 = vcombine.low %v449_v25, %v450_v26  ;;  %v451_v35 = vadd.bf16 %v435_v28, %v387_v19  ;;  %v452_v41 = vadd.bf16 %v436_v30, %v388_v27  ;;  %v408_v42 = vld [vmem:[%s1425_s1 + $0x24] sm:$0xf]  ;;  %v423_v43 = vld [vmem:[%s1422_s23 + $0x20] sm:$0xf]  ;;  %v409_v52 = vld [vmem:[%s1425_s1 + $0x28] sm:$0xf] }
  0xaa   : > { %796 = vmatpush3.bf16.msra.mxu0 %v773_v24  ;;  %v424_v44 = vld [vmem:[%s1422_s23 + $0x24] sm:$0xf]  ;;  %v453_v45 = vadd.bf16 %v437_v38, %v389_v36  ;;  %v454_v46 = vadd.bf16 %v438_v39, %v390_v37  ;;  %v391_v48 = vld [vmem:[%s1416_s7 + $0x20] sm:$0xf]  ;;  %v439_v50 = vmul.bf16 %v423_v43, %v407_v40  ;;  %v410_v53 = vld [vmem:[%s1425_s1 + $0x2c] sm:$0xf] }
  0xab   : > { %797 = vmatprep.subr.bf16.mxu0 %v1124_v0  ;;  %v775_v47 = vcombine.low %v451_v35, %v452_v41  ;;  %v392_v49 = vld [vmem:[%s1416_s7 + $0x24] sm:$0xf]  ;;  %v440_v51 = vmul.bf16 %v424_v44, %v408_v42  ;;  %v425_v54 = vld [vmem:[%s1422_s23 + $0x28] sm:$0xf]  ;;  %v426_v55 = vld [vmem:[%s1422_s23 + $0x2c] sm:$0xf] }
  0xac   : > { %v776_v56 = vcombine.low %v453_v45, %v454_v46  ;;  %v393_v57 = vld [vmem:[%s1416_s7 + $0x28] sm:$0xf]  ;;  %v411_v58 = vld [vmem:[%s1425_s1 + $0x30] sm:$0xf]  ;;  %v455_v59 = vadd.bf16 %v439_v50, %v391_v48  ;;  %v441_v61 = vmul.bf16 %v425_v54, %v409_v52  ;;  %v442_v62 = vmul.bf16 %v426_v55, %v410_v53  ;;  %v394_v1 = vld [vmem:[%s1416_s7 + $0x2c] sm:$0xf] }
  0xad   : > { %v456_v60 = vadd.bf16 %v440_v51, %v392_v49  ;;  %v427_v63 = vld [vmem:[%s1422_s23 + $0x30] sm:$0xf]  ;;  %v412_v2 = vld [vmem:[%s1425_s1 + $0x34] sm:$0xf]  ;;  %v413_v11 = vld [vmem:[%s1425_s1 + $0x38] sm:$0xf] }
  0xae   : > { %798 = vmatpush3.bf16.msra.mxu0 %v774_v34  ;;  %v428_v3 = vld [vmem:[%s1422_s23 + $0x34] sm:$0xf]  ;;  %v443_v4 = vmul.bf16 %v427_v63, %v411_v58  ;;  %v457_v6 = vadd.bf16 %v441_v61, %v393_v57  ;;  %v458_v7 = vadd.bf16 %v442_v62, %v394_v1  ;;  %v395_v8 = vld [vmem:[%s1416_s7 + $0x30] sm:$0xf]  ;;  %v414_v12 = vld [vmem:[%s1425_s1 + $0x3c] sm:$0xf] }
  0xaf   : > { %799 = vmatprep.subr.bf16.mxu0 %v1124_v0  ;;  %v777_v5 = vcombine.low %v455_v59, %v456_v60  ;;  %v396_v9 = vld [vmem:[%s1416_s7 + $0x34] sm:$0xf]  ;;  %v444_v10 = vmul.bf16 %v428_v3, %v412_v2  ;;  %v429_v13 = vld [vmem:[%s1422_s23 + $0x38] sm:$0xf]  ;;  %v430_v14 = vld [vmem:[%s1422_s23 + $0x3c] sm:$0xf] }
  0xb0   : > { %v459_v15 = vadd.bf16 %v443_v4, %v395_v8  ;;  %v778_v16 = vcombine.low %v457_v6, %v458_v7  ;;  %v445_v18 = vmul.bf16 %v429_v13, %v413_v11  ;;  %v446_v19 = vmul.bf16 %v430_v14, %v414_v12  ;;  %v397_v20 = vld [vmem:[%s1416_s7 + $0x38] sm:$0xf]  ;;  %v398_v21 = vld [vmem:[%s1416_s7 + $0x3c] sm:$0xf]  ;;  %s374_s27 = scalar_select %p373_p3, %s1107_s21, 1 }
  0xb1   : > { %v460_v17 = vadd.bf16 %v444_v10, %v396_v9  ;;  %v906_v26 = vld [vmem:[#allocation2] sm:$0xff]   ;;  %s771_s28 = sshll.u32 %s1413_s16, 4  ;;  %s1612_s15 = sld [smem:[#allocation20_spill]] }
  0xb2   : > { %800 = vmatpush3.bf16.msra.mxu0 %v775_v47  ;;  %v461_v23 = vadd.bf16 %v445_v18, %v397_v20  ;;  %v462_v24 = vadd.bf16 %v446_v19, %v398_v21  ;;  %s375_s14 = scalar_lea.vmem %s1553_s4, %s374_s27  ;;  %s783_s26 = sshll.u32 %s1107_s21, 7 }
  0xb3   : > { %801 = vmatprep.subr.bf16.mxu0 %v1124_v0  ;;  %v779_v22 = vcombine.low %v459_v15, %v460_v17  ;;  %v781_v28 = vld [vmem:[%s375_s14] ss:$0 sm:$0xff]  ;;  %s369_s10 = scalar_lea.vmem [#allocation10], %s771_s28  ;;  %s1613_s25 = sld [smem:[#allocation24_spill]] }
  0xb4   : > { %v780_v25 = vcombine.low %v461_v23, %v462_v24  ;;  %s602_s12 = sshll.u32 %s369_s10, 4  ;;  %s590_s21 = scalar_lea.sflag [#allocation4], %s1413_s16  ;;  %s1500_s12 = int_to_ptr.vmem [resolvable:$true] %s602_s12 }
  0xb5   : > { %s1025_s6 = scalar_lea.vmem %s1500_s12, 256  ;;  %s1126_s17 = smov [#allocation10]  }
  0xb6   : > { %802 = vmatpush3.bf16.msra.mxu0 %v776_v56  ;;  %p1026_p13 = scmp.ne.s32.totalorder %s1500_s12, %s1025_s6  ;;  %s1029_s22 = sshll.u32 %s1126_s17, 4  ;;  %s1030_s22 = int_to_ptr.vmem [resolvable:$false] %s1029_s22 }
  0xb7   : > { %803 = vmatprep.subr.bf16.mxu0 %v1124_v0  ;;  %p1614_p11 = scmp.ne.s32.totalorder %s1612_s15, 0  ;;  %s1031_s2 = scalar_lea.vmem %s1030_s22, 512 }
  0xb8   : > { %p1032_p10 = scmp.lt.s32.totalorder %s1500_s12, %s1030_s22  ;;  %p1033_p7 = scmp.lt.s32.totalorder %s1031_s2, %s1025_s6 }
  0xb9   : > { %s1498_s8 = scalar_lea.hbm %s1613_s25, %s783_s26  ;;  %p1027_p0 = pnand %p1026_p13, %p1614_p11 }
  0xba   : > { %804 = vmatpush3.bf16.msra.mxu0 %v777_v5  ;;  %p1034_p4 = por %p1033_p7, %p1032_p10 }
  0xbb   : > { %805 = vmatprep.subr.bf16.mxu0 %v1124_v0  ;;  %p1028_p5 = pneg %p1027_p0 }
  0xbd   : > { %p1035_p2 = pnand %p1034_p4, %p1028_p5 }
  0xbe   : > { %806 = vmatpush3.bf16.msra.mxu0 %v778_v16 }
  0xbf   : > { %807 = vmatprep.subr.bf16.mxu0 %v1124_v0 }
  0xc2   : > { %808 = vmatpush3.bf16.msra.mxu0 %v779_v22 }
  0xc3   : > { %809 = vmatprep.subr.bf16.mxu0 %v1124_v0 }
  0xc6   : > { %810 = vmatpush3.bf16.msra.mxu0 %v780_v25 }
  0xc9   : > { %812 = vmatmul.mubr.bf16.vlgmr.msra.gmra.mrb[0].mxu0 %v906_v26 }
 0x19c   : > { %v560_v27 = vpop.f32.mrb[0].mxu0 }
 0x19d   : > { %v813_v29 = vpop.f32.mrb[1].mxu0  ;;  %v583_v31 = vadd.f32 %v781_v28, %v560_v27 }
 0x19e   : > { %v563_v30 = vpop.f32.mrb[2].mxu0 }
 0x19f   : > { %v814_v32 = vpop.f32.mrb[3].mxu0  ;;  %v585_v0 = vmax.f32 %v583_v31, 0.0  ;;  %v584_v33 = vadd.f32 %v781_v28, %v563_v30 }
 0x1a1   : > { %587 = vst [vmem:[%s369_s10] sm:$0xff] %v585_v0  ;;  %v586_v34 = vmax.f32 %v584_v33, 0.0 }
 0x1a3   : > { %588 = vst [vmem:[%s369_s10 + $0x8] sm:$0xff] %v586_v34 }
 0x1a4   : > { %1038 = shalt.err (!%p1035_p2)
}
 0x1a5   : > { %s1039_s13 = scalar_lea.hbm %s1498_s8, 256  ;;  %s1043_s7 = scalar_lea.hbm %s1613_s25, 512 }
 0x1a6   : > { %p1040_p6 = scmp.ne.s32.totalorder %s1498_s8, %s1039_s13  ;;  %p1044_p12 = scmp.lt.u32.totalorder %s1498_s8, %s1613_s25 }
 0x1a7   : > { %p1045_p1 = scmp.lt.u32.totalorder %s1043_s7, %s1039_s13  ;;  %p1047_p13 = scmp.lt.u32.totalorder %s1039_s13, %s1498_s8 }
 0x1a8   : > { %p1041_p9 = pnand %p1040_p6, %p1614_p11 }
 0x1a9   : > { %p1046_p3 = por %p1045_p1, %p1044_p12 }
 0x1aa   : > { %p1042_p8 = pneg %p1041_p9 }
 0x1ab   : > { %p1048_p0 = por %p1047_p13, %p1046_p3 }
 0x1ad   : > { %p1049_p5 = pnand %p1048_p0, %p1042_p8 }
 0x1af   : > { %1052 = shalt.err (!%p1049_p5)
}
 0x1b0   : > { %s1127_s1 = smov 128   ;;  %s1128_s27 = smov 256  }
 0x1b1   : > { %s1129_s28 = smov 8  }
 0x1b2   : > { %825 = dma.vmem_to_hbm [thread:$0]  (%p1614_p11), %s1500_s12, 256, %s1498_s8, %s590_s21, %s1127_s1, %s1128_s27, %s1129_s28  }
 0x1b3 PF: > { %s1615_s24 = sld [smem:[#allocation15_spill]]  ;;  %s1616_s30 = sld [smem:[#allocation21_spill]] }
 0x1b4   : > { %s1617_s14 = sld [smem:[#allocation17_spill]] }
 0x1b9   : > { %s617_s26 = sand.u32 1, %s1615_s24   ;;  %p1618_p10 = scmp.ne.s32.totalorder %s1616_s30, 0 }
 0x1ba   : > { %p1619_p7 = scmp.ge.s32.totalorder %s1617_s14, 2  ;;  %s618_s10 = scalar_lea.sflag [#allocation4], %s617_s26 }
 0x1bc   : > { %p842_p4 = pnand %p1619_p7, %p1618_p10 }
 0x1be   : > { %1090 = dma.done.wait (!%p842_p4), %s618_s10, 256  }
 0x1bf   : > { %1092 = vsyncadd (!%p842_p4), %s618_s10, 4294967040  ;;  %s25_s23 = sadd.s32 1, %s1617_s14   ;;  %s1620_s11 = sld [smem:[#allocation19_spill]] }
 0x1c0   : > { %p22_p2 = scmp.ge.s32.totalorder %s25_s23, 4   ;;  %s1621_s21 = sld [smem:[#allocation16_spill]] }
 0x1c1   : > { %s1622_s22 = sld [smem:[#allocation18_spill]]  ;;  %s1623_s18 = smov %s1099_s19 }
 0x1c2   : > { %s1624_s19 = smov %s1103_s20  ;;  %24 = sbr.rel (!%p22_p2) target bundleno = 13 (0xd), region = 126 }
 0x1c5   : > { %s1625_s20 = smov %s1620_s11 }
 0x1c9   :  { %623 = vsyncpa [#allocation3], 1 }
 0x1ca   :  { %625 = vsyncpa [#allocation3 + $0x1], 1 }
 0x1cb   :  { %626 = vsyncpa [#allocation6], 1 }
 0x1cc   :  { %628 = vsyncpa [#allocation6 + $0x1], 1 }
 0x1cd   :  { %629 = vsyncpa [#allocation9], 1 }
 0x1ce   :  { %631 = vsyncpa [#allocation9 + $0x1], 1 }
 0x1cf   :  { %632 = vsyncpa [#allocation4], 1 }
 0x1d0   :  { %634 = vsyncpa [#allocation4 + $0x1], 1 }

</bundles_post_ra>
